<compile_context>
chip_gen: v5e
topology: v5e:2x2
jax: 0.10.0
libtpu: 0.0.40
codegen_flags: <defaults>
</compile_context>

<pallas_src>
import functools

import jax
import jax.numpy as jnp
from jax.experimental import pallas as pl
from jax.experimental.pallas import tpu as pltpu


# ---------------------------------------------------------------------------
# Helpers
# ---------------------------------------------------------------------------
def _round_up(x, m):
    return (x + m - 1) // m * m


def _pick_tm(m, target=512):
    """Row-tile size: big enough to amortize the ~0.35us/step grid overhead,
    never larger than the (8-rounded) problem size."""
    return min(target, _round_up(m, 8))


# ---------------------------------------------------------------------------
# Kernel 1: plain linear  y = x @ W + b   (value_proj)
# ---------------------------------------------------------------------------
def _linear_kernel(x_ref, w_ref, b_ref, o_ref):
    o_ref[...] = (
        jnp.dot(x_ref[...], w_ref[...], preferred_element_type=jnp.float32)
        + b_ref[...]
    ).astype(o_ref.dtype)


def pallas_linear(x, w, b, *, tm=None):
    """x: (M, K), w: (K, N), b: (N,) -> (M, N). Handles M not divisible by tm."""
    M, K = x.shape
    N = w.shape[1]
    if tm is None:
        tm = _pick_tm(M)
    m_pad = _round_up(M, tm)
    if m_pad != M:
        x = jnp.pad(x, ((0, m_pad - M), (0, 0)))
    b2 = b.reshape(1, N)
    out = pl.pallas_call(
        _linear_kernel,
        out_shape=jax.ShapeDtypeStruct((m_pad, N), x.dtype),
        grid=(m_pad // tm,),
        in_specs=[
            pl.BlockSpec((tm, K), lambda i: (i, 0)),
            pl.BlockSpec((K, N), lambda i: (0, 0)),   # weights stay resident
            pl.BlockSpec((1, N), lambda i: (0, 0)),
        ],
        out_specs=pl.BlockSpec((tm, N), lambda i: (i, 0)),
        compiler_params=pltpu.CompilerParams(dimension_semantics=("parallel",)),
    )(x, w, b2)
    return out[:M] if m_pad != M else out


# ---------------------------------------------------------------------------
# Kernel 2: fused sampling_offsets + attention_weights (+ per-head softmax)
# ---------------------------------------------------------------------------
def _query_fused_kernel(x_ref, w_ref, b_ref, g_ref, so_ref, aw_ref, *, n_off):
    """One full-width matmul over the concatenated projection, then:
       - first n_off columns -> sampling offsets (straight lane-dense store)
       - remaining columns   -> per-head softmax via block-diagonal ones matmul.
    """
    x = x_ref[...]
    y = (
        jnp.dot(x, w_ref[...], preferred_element_type=jnp.float32) + b_ref[...]
    )  # (tm, n_off + n_aw) f32 — single MXU push per tile

    # --- sampling offsets: lane-dense copy-out (n_off is a multiple of 128 here)
    so_ref[...] = y[:, :n_off].astype(so_ref.dtype)

    # --- attention weights: softmax over each group of `per_head` columns.
    logits = y[:, n_off:]                                   # (tm, n_aw)
    # Row-global max is sufficient for stability: the common factor
    # exp(group_max - row_max) cancels between numerator and denominator.
    m = jnp.max(logits, axis=-1, keepdims=True)
    e = jnp.exp(logits - m)
    # Per-group sums broadcast back to every column of the group via one
    # (n_aw, n_aw) block-diagonal ones matmul — lane-dense, no reshape,
    # no per-head lane slicing. The ones matrix is a precomputed input.
    s = jnp.dot(e, g_ref[...], preferred_element_type=jnp.float32)
    s = jnp.maximum(s, jnp.finfo(jnp.float32).tiny)         # div-by-zero guard (unreachable in practice)
    aw_ref[...] = (e * pl.reciprocal(s, approx=True)).astype(aw_ref.dtype)


def pallas_query_fused(x, w, b, *, n_heads, per_head, tm=None):
    """x: (M, K); w: (K, n_off + n_heads*per_head) pre-concatenated; b matching.
    Returns (so: (M, n_off), aw: (M, n_heads*per_head)) with aw softmax'd per head."""
    M, K = x.shape
    n_aw = n_heads * per_head
    n_tot = w.shape[1]
    n_off = n_tot - n_aw
    if tm is None:
        tm = _pick_tm(M)
    m_pad = _round_up(M, tm)
    if m_pad != M:
        x = jnp.pad(x, ((0, m_pad - M), (0, 0)))
    b2 = b.reshape(1, n_tot)

    # Block-diagonal ones matrix: group[c, j] = 1 iff columns c, j share a head.
    col = jax.lax.broadcasted_iota(jnp.int32, (n_aw, n_aw), 0) // per_head
    row = jax.lax.broadcasted_iota(jnp.int32, (n_aw, n_aw), 1) // per_head
    group = (col == row).astype(jnp.float32)

    kernel = functools.partial(_query_fused_kernel, n_off=n_off)
    so, aw = pl.pallas_call(
        kernel,
        out_shape=(
            jax.ShapeDtypeStruct((m_pad, n_off), x.dtype),
            jax.ShapeDtypeStruct((m_pad, n_aw), x.dtype),
        ),
        grid=(m_pad // tm,),
        in_specs=[
            pl.BlockSpec((tm, K), lambda i: (i, 0)),
            pl.BlockSpec((K, n_tot), lambda i: (0, 0)),   # concatenated weights resident
            pl.BlockSpec((1, n_tot), lambda i: (0, 0)),
            pl.BlockSpec((n_aw, n_aw), lambda i: (0, 0)),  # group matrix resident
        ],
        out_specs=(
            pl.BlockSpec((tm, n_off), lambda i: (i, 0)),
            pl.BlockSpec((tm, n_aw), lambda i: (i, 0)),
        ),
        compiler_params=pltpu.CompilerParams(dimension_semantics=("parallel",)),
    )(x, w, b2, group)
    if m_pad != M:
        so, aw = so[:M], aw[:M]
    return so, aw


# ---------------------------------------------------------------------------
# Module equivalent
# ---------------------------------------------------------------------------
class MultiResMultiFreqDeformAttnBaseJAX:
    """JAX/Pallas port of MultiResMultiFreqDeformAttnBase._compute_deformable_attention."""

    def __init__(self, key, d_model=128, n_levels=2, n_freqs=2, n_heads=8, n_points=4,
                 dtype=jnp.float32):
        assert d_model % n_heads == 0
        self.d_model = d_model
        self.n_levels = n_levels
        self.n_freqs = n_freqs
        self.n_heads = n_heads
        self.n_points = n_points

        off_out = n_heads * n_levels * n_freqs * n_points * 2
        aw_out = n_heads * n_levels * n_freqs * n_points

        ks = jax.random.split(key, 8)
        scale = 0.02
        # weights stored as (in_features, out_features)  == PyTorch W.T
        self.sampling_offsets_w = scale * jax.random.normal(ks[0], (d_model, off_out), dtype)
        self.sampling_offsets_b = scale * jax.random.normal(ks[1], (off_out,), dtype)
        self.attention_weights_w = scale * jax.random.normal(ks[2], (d_model, aw_out), dtype)
        self.attention_weights_b = scale * jax.random.normal(ks[3], (aw_out,), dtype)
        self.value_proj_w = scale * jax.random.normal(ks[4], (d_model, d_model), dtype)
        self.value_proj_b = scale * jax.random.normal(ks[5], (d_model,), dtype)
        # output_proj is declared in __init__ but unused by _compute_deformable_attention.
        self.output_proj_w = scale * jax.random.normal(ks[6], (d_model, d_model), dtype)
        self.output_proj_b = scale * jax.random.normal(ks[7], (d_model,), dtype)

        # Pre-concatenated query-side projection so the fused kernel reads q once.
        self.qproj_w = jnp.concatenate(
            [self.sampling_offsets_w, self.attention_weights_w], axis=1)
        self.qproj_b = jnp.concatenate(
            [self.sampling_offsets_b, self.attention_weights_b])

    def compute_deformable_attention(self, query, input_flatten):
        """query: (B, Len_q, d_model), input_flatten: (B, Len_in, d_model)."""
        B, Len_q, _ = query.shape
        Len_in = input_flatten.shape[1]
        H, F_, L, P, D = self.n_heads, self.n_freqs, self.n_levels, self.n_points, self.d_model

        q2 = query.reshape(B * Len_q, D)
        v2 = input_flatten.reshape(B * Len_in, D)

        # --- value = value_proj(input_flatten).view(B, -1, H, D // H)
        value = pallas_linear(v2, self.value_proj_w, self.value_proj_b)
        value = value.reshape(B, Len_in, H, D // H)

        # --- fused sampling_offsets + attention_weights (+ per-head softmax)
        so, aw = pallas_query_fused(
            q2, self.qproj_w, self.qproj_b, n_heads=H, per_head=F_ * L * P,
        )
        # .view(B, Lq, H, F, L, P, 2).flatten(3, 4)
        sampling_offsets = so.reshape(B, Len_q, H, F_, L, P, 2).reshape(
            B, Len_q, H, F_ * L, P, 2
        )
        # softmax already applied per head inside the kernel; just view.
        attention_weights = aw.reshape(B, Len_q, H, F_ * L, P)

        return value, sampling_offsets, attention_weights


# ---------------------------------------------------------------------------
# Reference (plain JAX) for correctness check
# ---------------------------------------------------------------------------
def reference_compute(mod, query, input_flatten):
    B, Len_q, _ = query.shape
    Len_in = input_flatten.shape[1]
    H, F_, L, P, D = mod.n_heads, mod.n_freqs, mod.n_levels, mod.n_points, mod.d_model
    hi = jax.lax.Precision.HIGHEST

    value = jnp.einsum("bld,dn->bln", input_flatten, mod.value_proj_w,
                       precision=hi) + mod.value_proj_b
    value = value.reshape(B, Len_in, H, D // H)

    so = jnp.einsum("bld,dn->bln", query, mod.sampling_offsets_w,
                    precision=hi) + mod.sampling_offsets_b
    so = so.reshape(B, Len_q, H, F_, L, P, 2).reshape(B, Len_q, H, F_ * L, P, 2)

    aw = jnp.einsum("bld,dn->bln", query, mod.attention_weights_w,
                    precision=hi) + mod.attention_weights_b
    aw = aw.reshape(B, Len_q, H, F_ * L * P)
    aw = jax.nn.softmax(aw, axis=-1)
    aw = aw.reshape(B, Len_q, H, F_ * L, P)
    return value, so, aw


if __name__ == "__main__":
    key = jax.random.PRNGKey(0)
    k_mod, k_q, k_v = jax.random.split(key, 3)

    # Small shapes consistent with the module (d_model divisible by n_heads, lane-dense).
    B, Len_q, Len_in = 2, 8, 16
    d_model, n_levels, n_freqs, n_heads, n_points = 128, 2, 2, 8, 4

    mod = MultiResMultiFreqDeformAttnBaseJAX(
        k_mod, d_model=d_model, n_levels=n_levels, n_freqs=n_freqs,
        n_heads=n_heads, n_points=n_points,
    )

    query = jax.random.normal(k_q, (B, Len_q, d_model), jnp.float32)
    input_flatten = jax.random.normal(k_v, (B, Len_in, d_model), jnp.float32)

    value, sampling_offsets, attention_weights = jax.block_until_ready(
        mod.compute_deformable_attention(query, input_flatten)
    )

    # Shapes match the PyTorch semantics.
    assert value.shape == (B, Len_in, n_heads, d_model // n_heads)
    assert sampling_offsets.shape == (B, Len_q, n_heads, n_freqs * n_levels, n_points, 2)
    assert attention_weights.shape == (B, Len_q, n_heads, n_freqs * n_levels, n_points)

    # Numerical check against a pure-JAX reference (HIGHEST precision matmuls).
    ref_v, ref_so, ref_aw = reference_compute(mod, query, input_flatten)
    assert jnp.allclose(value, ref_v, atol=1e-4, rtol=1e-4)
    assert jnp.allclose(sampling_offsets, ref_so, atol=1e-4, rtol=1e-4)
    # attention weights use the EUP approx reciprocal -> slightly looser tolerance
    assert jnp.allclose(attention_weights, ref_aw, atol=1e-2, rtol=1e-2)
    # softmax rows sum to ~1 per head group
    assert jnp.allclose(
        attention_weights.reshape(B, Len_q, n_heads, -1).sum(-1), 1.0, atol=1e-2
    )

    print("KERNEL_OK")
</pallas_src>

<mosaic_0001>
module attributes {stable_mosaic.version = 11 : i64} {
  func.func @_linear_kernel(%arg0: i32, %arg1: memref<32x128xf32, #tpu.memory_space<vmem>>, %arg2: memref<128x128xf32, #tpu.memory_space<vmem>>, %arg3: memref<1x128xf32, #tpu.memory_space<vmem>>, %arg4: memref<32x128xf32, #tpu.memory_space<vmem>>) attributes {dimension_semantics = [#tpu.dimension_semantics<parallel>], iteration_bounds = array<i64: 1>, scalar_prefetch = 0 : i64, scratch_operands = 0 : i64, tpu.core_type = #tpu.core_type<tc>, window_params = [{transform_indices = @transform_0, window_bounds = array<i64: 32, 128>}, {pipeline_mode = #tpu.pipeline_mode<synchronous>, transform_indices = @transform_1, window_bounds = array<i64: 128, 128>}, {pipeline_mode = #tpu.pipeline_mode<synchronous>, transform_indices = @transform_2, window_bounds = array<i64: 1, 128>}, {transform_indices = @transform_3, window_bounds = array<i64: 32, 128>}]} {
    %c0 = arith.constant 0 : index
    %c0_0 = arith.constant 0 : index
    %0 = vector.load %arg1[%c0, %c0_0] : memref<32x128xf32, #tpu.memory_space<vmem>>, vector<32x128xf32>
    %c0_1 = arith.constant 0 : index
    %c0_2 = arith.constant 0 : index
    %1 = vector.load %arg2[%c0_1, %c0_2] : memref<128x128xf32, #tpu.memory_space<vmem>>, vector<128x128xf32>
    %cst = arith.constant dense<0.000000e+00> : vector<32x128xf32>
    %2 = tpu.matmul %0, %1, %cst {dimension_numbers = #tpu.dot_dimension_numbers<[1], [0], [0], [1], [0, 0, 1, 1], [], []>} : vector<32x128xf32>, vector<128x128xf32>, vector<32x128xf32> -> vector<32x128xf32>
    %c0_3 = arith.constant 0 : index
    %c0_4 = arith.constant 0 : index
    %3 = vector.load %arg3[%c0_3, %c0_4] : memref<1x128xf32, #tpu.memory_space<vmem>>, vector<1x128xf32>
    %4 = vector.broadcast %3 : vector<1x128xf32> to vector<32x128xf32>
    %5 = arith.addf %2, %4 : vector<32x128xf32>
    %c0_5 = arith.constant 0 : index
    %c0_6 = arith.constant 0 : index
    %6 = vector.load %arg4[%c0_5, %c0_6] : memref<32x128xf32, #tpu.memory_space<vmem>>, vector<32x128xf32>
    tpu.vector_store %arg4[%c0_5, %c0_6], %5 {strides = array<i32>} : memref<32x128xf32, #tpu.memory_space<vmem>>, vector<32x128xf32>,
    return
  }
  func.func @transform_0(%arg0: i32) -> (i32, i32) {
    %c0_i32 = arith.constant 0 : i32
    %c0_i32_0 = arith.constant 0 : i32
    return %arg0, %c0_i32 : i32, i32
  }
  func.func @transform_1(%arg0: i32) -> (i32, i32) {
    %c0_i32 = arith.constant 0 : i32
    %c0_i32_0 = arith.constant 0 : i32
    %c0_i32_1 = arith.constant 0 : i32
    return %c0_i32, %c0_i32_0 : i32, i32
  }
  func.func @transform_2(%arg0: i32) -> (i32, i32) {
    %c0_i32 = arith.constant 0 : i32
    %c0_i32_0 = arith.constant 0 : i32
    %c0_i32_1 = arith.constant 0 : i32
    return %c0_i32, %c0_i32_0 : i32, i32
  }
  func.func @transform_3(%arg0: i32) -> (i32, i32) {
    %c0_i32 = arith.constant 0 : i32
    %c0_i32_0 = arith.constant 0 : i32
    return %arg0, %c0_i32 : i32, i32
  }
}

</mosaic_0001>

<bundles_post_ra>
// kernel: tpu_custom_call.1
= control target key start
LH: loop header
LB: loop body
LE: loop exit
PB: predicated region body
PF: predicated region fallthrough
CT: control target
= control target key end

     0   :  { %8 = vsyncpa [#allocation3], 0  ;;  %s302_s0 = inlined_call_operand.hbm [shape: f32[32,128], index: 0, kind: input, shape index: {}]   ;;  %s303_s1 = inlined_call_operand.hbm [shape: f32[128,128], index: 1, kind: input, shape index: {}]   ;;  %s304_s2 = inlined_call_operand.vmem [shape: f32[1,128], index: 2, kind: input, shape index: {}]   ;;  %s305_s3 = inlined_call_operand.hbm [shape: f32[32,128], index: 3, kind: output, shape index: {}]  }
   0x1   :  { %9 = vsyncpa [#allocation6], 0 }
   0x2   :  { %10 = vsyncpa [#allocation4], 0  ;;  %s15_s14 = sshll.u32 %s302_s0, 4  ;;  %s256_s15 = smov [#allocation2]   ;;  %s16_s14 = int_to_ptr.hbm [resolvable:$true] %s15_s14 }
   0x3   :  { %s17_s16 = sshll.u32 %s256_s15, 4  ;;  %s28_s19 = sshll.u32 %s303_s1, 4  ;;  %s18_s16 = int_to_ptr.vmem [resolvable:$true] %s17_s16  ;;  %s29_s19 = int_to_ptr.hbm [resolvable:$true] %s28_s19 }
   0x4   :  { %s257_s20 = smov 128   ;;  %s258_s21 = smov 8  }
   0x5   :  { %23 = dma.hbm_to_vmem [thread:$0]  %s16_s14, 512, %s18_s16, [#allocation3], %s257_s20, %s257_s20, %s258_s21  }
   0x6   :  { %s259_s22 = smov [#allocation5]  }
   0x7   :  { %s30_s23 = sshll.u32 %s259_s22, 4  ;;  %s31_s23 = int_to_ptr.vmem [resolvable:$true] %s30_s23 }
   0x8   :  { %36 = dma.hbm_to_vmem [thread:$0]  %s29_s19, 2048, %s31_s23, [#allocation6], %s257_s20, %s257_s20, %s258_s21  }
   0x9   :  { %250 = dma.done.wait [#allocation3], 512  }
   0xa   :  { %251 = vsyncadd [#allocation3], 4294966784 }
   0xb   :  { %252 = dma.done.wait [#allocation6], 2048  }
   0xc   :  { %253 = vsyncadd [#allocation6], 4294965248  ;;  %v66_v0 = vld [vmem:[#allocation5 + $0x78] sm:$0xff]  ;;  %v65_v1 = vld [vmem:[#allocation5 + $0x70] sm:$0xff]  ;;  %s260_s24 = smov [#allocation7]   ;;  %s110_s28 = sshll.u32 %s305_s3, 4  ;;  %s111_s28 = int_to_ptr.hbm [resolvable:$true] %s110_s28 }
   0xd   :  { %125 = vmatpush.msra.mxu2 %v66_v0  ;;  %126 = vmatpush.msra.mxu3 %v66_v0  ;;  %v64_v2 = vld [vmem:[#allocation5 + $0x68] sm:$0xff]  ;;  %v63_v3 = vld [vmem:[#allocation5 + $0x60] sm:$0xff]  ;;  %v62_v4 = vld [vmem:[#allocation5 + $0x58] sm:$0xff]  ;;  %s108_s25 = sshll.u32 %s260_s24, 4  ;;  %s109_s25 = int_to_ptr.vmem [resolvable:$true] %s108_s25 }
   0xe   :  { %71 = vmatpush.msra.mxu0 %v66_v0  ;;  %124 = vmatpush.msra.mxu1 %v66_v0  ;;  %v61_v5 = vld [vmem:[#allocation5 + $0x50] sm:$0xff]  ;;  %v60_v6 = vld [vmem:[#allocation5 + $0x48] sm:$0xff]  ;;  %v59_v7 = vld [vmem:[#allocation5 + $0x40] sm:$0xff] }
   0xf   :  { %128 = vmatpush.msra.mxu2 %v65_v1  ;;  %129 = vmatpush.msra.mxu3 %v65_v1  ;;  %v58_v8 = vld [vmem:[#allocation5 + $0x38] sm:$0xff]  ;;  %v57_v9 = vld [vmem:[#allocation5 + $0x30] sm:$0xff]  ;;  %v56_v10 = vld [vmem:[#allocation5 + $0x28] sm:$0xff] }
  0x10   :  { %72 = vmatpush.msra.mxu0 %v65_v1  ;;  %127 = vmatpush.msra.mxu1 %v65_v1  ;;  %v55_v11 = vld [vmem:[#allocation5 + $0x20] sm:$0xff]  ;;  %v54_v12 = vld [vmem:[#allocation5 + $0x18] sm:$0xff]  ;;  %v53_v13 = vld [vmem:[#allocation5 + $0x10] sm:$0xff] }
  0x11   :  { %131 = vmatpush.msra.mxu2 %v64_v2  ;;  %132 = vmatpush.msra.mxu3 %v64_v2  ;;  %v52_v14 = vld [vmem:[#allocation5 + $0x8] sm:$0xff]  ;;  %v51_v15 = vld [vmem:[#allocation5] sm:$0xff]  ;;  %v49_v16 = vld [vmem:[#allocation2 + $0x10] sm:$0xff] }
  0x12   :  { %73 = vmatpush.msra.mxu0 %v64_v2  ;;  %130 = vmatpush.msra.mxu1 %v64_v2  ;;  %v50_v17 = vld [vmem:[#allocation2 + $0x18] sm:$0xff]  ;;  %v47_v18 = vld [vmem:[#allocation2] sm:$0xff]  ;;  %v48_v19 = vld [vmem:[#allocation2 + $0x8] sm:$0xff] }
  0x13   :  { %134 = vmatpush.msra.mxu2 %v63_v3  ;;  %135 = vmatpush.msra.mxu3 %v63_v3  ;;  %v177_v20 = vld [vmem:[%s304_s2] ss:$0 sm:$0xff] }
  0x14   :  { %74 = vmatpush.msra.mxu0 %v63_v3  ;;  %133 = vmatpush.msra.mxu1 %v63_v3 }
  0x15   :  { %137 = vmatpush.msra.mxu2 %v62_v4  ;;  %138 = vmatpush.msra.mxu3 %v62_v4 }
  0x16   :  { %75 = vmatpush.msra.mxu0 %v62_v4  ;;  %136 = vmatpush.msra.mxu1 %v62_v4 }
  0x17   :  { %140 = vmatpush.msra.mxu2 %v61_v5  ;;  %141 = vmatpush.msra.mxu3 %v61_v5 }
  0x18   :  { %76 = vmatpush.msra.mxu0 %v61_v5  ;;  %139 = vmatpush.msra.mxu1 %v61_v5 }
  0x19   :  { %143 = vmatpush.msra.mxu2 %v60_v6  ;;  %144 = vmatpush.msra.mxu3 %v60_v6 }
  0x1a   :  { %77 = vmatpush.msra.mxu0 %v60_v6  ;;  %142 = vmatpush.msra.mxu1 %v60_v6 }
  0x1b   :  { %146 = vmatpush.msra.mxu2 %v59_v7  ;;  %147 = vmatpush.msra.mxu3 %v59_v7 }
  0x1c   :  { %78 = vmatpush.msra.mxu0 %v59_v7  ;;  %145 = vmatpush.msra.mxu1 %v59_v7 }
  0x1d   :  { %149 = vmatpush.msra.mxu2 %v58_v8  ;;  %150 = vmatpush.msra.mxu3 %v58_v8 }
  0x1e   :  { %79 = vmatpush.msra.mxu0 %v58_v8  ;;  %148 = vmatpush.msra.mxu1 %v58_v8 }
  0x1f   :  { %152 = vmatpush.msra.mxu2 %v57_v9  ;;  %153 = vmatpush.msra.mxu3 %v57_v9 }
  0x20   :  { %80 = vmatpush.msra.mxu0 %v57_v9  ;;  %151 = vmatpush.msra.mxu1 %v57_v9 }
  0x21   :  { %155 = vmatpush.msra.mxu2 %v56_v10  ;;  %156 = vmatpush.msra.mxu3 %v56_v10 }
  0x22   :  { %81 = vmatpush.msra.mxu0 %v56_v10  ;;  %154 = vmatpush.msra.mxu1 %v56_v10 }
  0x23   :  { %158 = vmatpush.msra.mxu2 %v55_v11  ;;  %159 = vmatpush.msra.mxu3 %v55_v11 }
  0x24   :  { %82 = vmatpush.msra.mxu0 %v55_v11  ;;  %157 = vmatpush.msra.mxu1 %v55_v11 }
  0x25   :  { %161 = vmatpush.msra.mxu2 %v54_v12  ;;  %162 = vmatpush.msra.mxu3 %v54_v12 }
  0x26   :  { %83 = vmatpush.msra.mxu0 %v54_v12  ;;  %160 = vmatpush.msra.mxu1 %v54_v12 }
  0x27   :  { %164 = vmatpush.msra.mxu2 %v53_v13  ;;  %165 = vmatpush.msra.mxu3 %v53_v13 }
  0x28   :  { %84 = vmatpush.msra.mxu0 %v53_v13  ;;  %163 = vmatpush.msra.mxu1 %v53_v13 }
  0x29   :  { %167 = vmatpush.msra.mxu2 %v52_v14  ;;  %168 = vmatpush.msra.mxu3 %v52_v14 }
  0x2a   :  { %85 = vmatpush.msra.mxu0 %v52_v14  ;;  %166 = vmatpush.msra.mxu1 %v52_v14 }
  0x2b   :  { %170 = vmatpush.msra.mxu2 %v51_v15  ;;  %171 = vmatpush.msra.mxu3 %v51_v15 }
  0x2c   :  { %93 = vmatmul.f32.vlgmr.msra.gmra.mxu2 %v49_v16  ;;  %96 = vmatmul.f32.vlgmr.msra.gmra.mxu3 %v50_v17 }
  0x2d   :  { %86 = vmatpush.msra.mxu0 %v51_v15  ;;  %169 = vmatpush.msra.mxu1 %v51_v15 }
  0x2e   :  { %87 = vmatmul.f32.vlgmr.msra.gmra.mxu0 %v47_v18  ;;  %90 = vmatmul.f32.vlgmr.msra.gmra.mxu1 %v48_v19 }
  0xab   :  { %v88_v21 = vpop.f32.mrf.mxu0  ;;  %v91_v22 = vpop.f32.mrf.mxu1 }
  0xac   :  { %v89_v23 = vadd.f32 %v177_v20, %v88_v21  ;;  %v92_v24 = vadd.f32 %v177_v20, %v91_v22 }
  0xae   :  { %100 = vst [vmem:[#allocation7] sm:$0xff] %v89_v23 }
  0xaf   :  { %101 = vst [vmem:[#allocation7 + $0x8] sm:$0xff] %v92_v24  ;;  %v94_v25 = vpop.f32.mrf.mxu2  ;;  %v97_v26 = vpop.f32.mrf.mxu3 }
  0xb0   :  { %v95_v27 = vadd.f32 %v177_v20, %v94_v25  ;;  %v98_v28 = vadd.f32 %v177_v20, %v97_v26 }
  0xb2   :  { %102 = vst [vmem:[#allocation7 + $0x10] sm:$0xff] %v95_v27 }
  0xb3   :  { %103 = vst [vmem:[#allocation7 + $0x18] sm:$0xff] %v98_v28 }
  0xb4   :  { %116 = dma.vmem_to_hbm [thread:$0]  %s109_s25, 512, %s111_s28, [#allocation4], %s257_s20, %s257_s20, %s258_s21  }
  0xb5   :  { %254 = dma.done.wait [#allocation4], 512  }
  0xb6   :  { %255 = vsyncadd [#allocation4], 4294966784 }
  0xb7   :  { %121 = vsyncpa [#allocation3], 1 }
  0xb8   :  { %122 = vsyncpa [#allocation6], 1 }
  0xb9   :  { %123 = vsyncpa [#allocation4], 1 }

</bundles_post_ra>
